<compile_context>
chip_gen: v7x
topology: tpu7x:2x2x1
jax: 0.10.0
libtpu: 0.0.40
codegen_flags: <defaults>
</compile_context>

<pallas_src>
import functools

import jax
import jax.numpy as jnp
from jax.experimental import pallas as pl
from jax.experimental.pallas import tpu as pltpu


def _modulating_factor(q, gamma):
    """(1 - p) ** gamma, specialized to VPU multiplies for small integer gamma."""
    g = float(gamma)
    if g == 0.0:
        return jnp.ones_like(q)
    if g == int(g) and 1.0 <= g <= 8.0:
        out = q
        for _ in range(int(g) - 1):
            out = out * q
        return out
    # Arbitrary non-integer gamma: fall back to pow to match reference semantics.
    return jnp.power(q, jnp.float32(g))


def _focal_loss_kernel(*refs, gamma, n_rows, tile_n, has_alpha, mask_rows):
    if has_alpha:
        x_ref, a_ref, o_ref = refs
    else:
        x_ref, o_ref = refs
        a_ref = None

    x = x_ref[...].astype(jnp.float32)                       # (tile_n, C)

    # Numerically stable softmax over the class (lane) axis.
    m = jnp.max(x, axis=-1, keepdims=True)                   # (tile_n, 1)
    xm = x - m
    e = jnp.exp(xm)                                          # 1 EUP exp / element
    s = jnp.sum(e, axis=-1, keepdims=True)                   # (tile_n, 1)
    inv_s = pl.reciprocal(s, approx=True)                    # EUP, ~free slot
    p = e * inv_s                                            # VPU multiply
    log_p = xm - jnp.log(s)                                  # only tile_n logs

    loss = _modulating_factor(1.0 - p, gamma) * log_p
    if a_ref is not None:
        # (1, C) per-class row, (tile_n, 1) per-sample, or (tile_n, C) full
        # weights; broadcasting happens in VMEM (free VPU work).
        loss = loss * a_ref[...].astype(jnp.float32)

    # Reduce over the class axis first; the ragged-tile mask is then applied to
    # the (tile_n, 1) per-row sums only (garbage rows from the overhanging last
    # block are row-local under softmax and are zeroed before the tile sum).
    loss_rows = jnp.sum(loss, axis=-1, keepdims=True)        # (tile_n, 1)
    if mask_rows:
        row = (pl.program_id(0) * tile_n
               + jax.lax.broadcasted_iota(jnp.int32, (tile_n, 1), 0))
        loss_rows = jnp.where(row < n_rows, loss_rows, 0.0)

    partial = jnp.sum(loss_rows)                             # scalar per tile

    # Per-tile lane-dense (8, 128) output block: partial at [0, 0], zeros
    # elsewhere.  No carried accumulator -> safe under "parallel" semantics.
    sub = jax.lax.broadcasted_iota(jnp.int32, (8, 128), 0)
    lane = jax.lax.broadcasted_iota(jnp.int32, (8, 128), 1)
    o_ref[...] = jnp.where((sub == 0) & (lane == 0), partial, 0.0)


def _vmem_capacity_bytes():
    try:
        info = pltpu.get_tpu_info()
        cap = getattr(info, "vmem_capacity_bytes", None)
        if cap:
            return int(cap)
    except Exception:
        pass
    return 64 * 1024 * 1024  # conservative (v7x-sized) fallback


def _choose_tile_n(n, c, itemsize, vmem_capacity_bytes):
    # Sub-32-bit dtypes pack along sublanes: keep row tiles a multiple of the
    # pack (8 for f32, 16 for bf16, 32 for int8/fp8).
    pack = max(8, 32 // max(1, itemsize))
    # Per-tile byte budget in the *input* dtype.  BlockSpec pipelining hits its
    # HBM-roofline plateau at multi-MiB tiles; leave headroom for the f32
    # working set + double buffering under the scoped-VMEM limit
    # (generation-aware: 128 MiB chips -> 4 MiB tiles, 64 MiB (v7x) -> 2 MiB).
    budget = max(2 << 20, min(4 << 20, vmem_capacity_bytes // 32))
    bytes_per_row = max(1, c * itemsize)
    budget_rows = max(pack, (budget // bytes_per_row) // pack * pack)
    if n <= budget_rows:
        return n  # single tile; block == full array, no ragged masking needed
    return budget_rows


def focal_loss(inputs, targets=None, alpha=None, gamma=2.0, size_average=True,
               *, _tile_rows=None):
    """Pallas TPU implementation of FocalLoss.forward.

    `targets` (and the reference's `options`) are accepted for API parity but,
    matching the reference PyTorch code, do not participate in the computation.
    """
    del targets  # unused by the reference forward pass
    inputs = jnp.asarray(inputs)
    N, C = inputs.shape
    itemsize = jnp.dtype(inputs.dtype).itemsize

    vmem_cap = _vmem_capacity_bytes()
    if _tile_rows is not None:
        tile_n = min(int(_tile_rows), N)
    else:
        tile_n = _choose_tile_n(N, C, itemsize, vmem_cap)
    grid_n = -(-N // tile_n)              # cdiv, no wrapper-side padding
    mask_rows = (N % tile_n) != 0

    in_arrays = [inputs]
    in_specs = [pl.BlockSpec((tile_n, C), lambda i: (i, 0))]
    alpha_bytes = 0

    has_alpha = alpha is not None
    if has_alpha:
        alpha = jnp.asarray(alpha, dtype=jnp.float32)
        if alpha.ndim <= 1 or alpha.shape == (1, C):
            # Scalar or per-class weights: keep a tiny (1, C) row and broadcast
            # inside the kernel -- no dense (N, C) HBM traffic.
            a2 = alpha.reshape(1, -1) if alpha.ndim else alpha.reshape(1, 1)
            alpha = jnp.broadcast_to(a2, (1, C))
            in_specs.append(pl.BlockSpec((1, C), lambda i: (0, 0)))
        elif alpha.shape == (N, 1):
            # Per-sample weights at natural shape; broadcast over C in VMEM.
            in_specs.append(pl.BlockSpec((tile_n, 1), lambda i: (i, 0)))
        else:
            # Full per-sample, per-class weights: tile alongside the logits.
            alpha = jnp.broadcast_to(alpha, (N, C))
            in_specs.append(pl.BlockSpec((tile_n, C), lambda i: (i, 0)))
        in_arrays.append(alpha)
        alpha_bytes = int(alpha.size) * 4

    kernel = functools.partial(
        _focal_loss_kernel,
        gamma=float(gamma),
        n_rows=N,
        tile_n=tile_n,
        has_alpha=has_alpha,
        mask_rows=mask_rows,
    )

    out_bytes = grid_n * 8 * 128 * 4
    cost = pl.CostEstimate(
        flops=10 * N * C,
        transcendentals=2 * N * C,
        bytes_accessed=int(inputs.size) * itemsize + alpha_bytes + out_bytes,
    )
    vmem_limit = max(32 << 20, min((vmem_cap * 3) // 4, vmem_cap - (8 << 20)))

    partials = pl.pallas_call(
        kernel,
        out_shape=jax.ShapeDtypeStruct((8 * grid_n, 128), jnp.float32),
        grid=(grid_n,),
        in_specs=in_specs,
        out_specs=pl.BlockSpec((8, 128), lambda i: (i, 0)),
        compiler_params=pltpu.CompilerParams(
            dimension_semantics=("parallel",),
            vmem_limit_bytes=int(vmem_limit)),
        cost_estimate=cost,
    )(*in_arrays)

    # Tiny finishing reduction (negation + mean-division folded here).
    total = -jnp.sum(partials)
    if size_average:
        total = total / jnp.float32(N * C)
    return total


def _focal_loss_ref(inputs, alpha=None, gamma=2.0, size_average=True):
    # Pure-JAX reference mirroring the PyTorch forward.
    N, C = inputs.shape
    a = jnp.ones((N, C), jnp.float32) if alpha is None else jnp.asarray(alpha, jnp.float32)
    p = jax.nn.softmax(inputs.astype(jnp.float32), axis=1)
    log_p = jnp.log(p)
    batch_loss = -a * jnp.power(1.0 - p, gamma) * log_p
    return batch_loss.mean() if size_average else batch_loss.sum()


if __name__ == "__main__":
    key = jax.random.PRNGKey(0)
    k_x, k_t, k_x2, k_x3 = jax.random.split(key, 4)

    # Case 1: alpha=None, mean reduction (single tile, no alpha input at all).
    N, C = 8, 32
    inputs = jax.random.normal(k_x, (N, C), dtype=jnp.float32)
    targets = jax.random.randint(k_t, (N,), 0, C)  # unused by the reference forward
    loss = jax.block_until_ready(
        focal_loss(inputs, targets, alpha=None, gamma=2.0, size_average=True))
    ref = _focal_loss_ref(inputs, alpha=None, gamma=2.0, size_average=True)
    assert jnp.allclose(loss, ref, rtol=2e-3, atol=1e-5), (loss, ref)

    # Case 2: per-class alpha, sum reduction, N not a sublane multiple
    # (block shape equals the full array -> still a single, unmasked tile).
    N2, C2 = 13, 32
    x2 = jax.random.normal(k_x2, (N2, C2), dtype=jnp.float32)
    a2 = jnp.linspace(0.5, 1.5, C2, dtype=jnp.float32)
    loss2 = jax.block_until_ready(
        focal_loss(x2, None, alpha=a2, gamma=2.0, size_average=False))
    ref2 = _focal_loss_ref(x2, alpha=a2, gamma=2.0, size_average=False)
    assert jnp.allclose(loss2, ref2, rtol=2e-3, atol=1e-4), (loss2, ref2)

    # Case 3: force a multi-tile grid with a ragged last tile (no wrapper pad,
    # per-tile partial outputs under "parallel" semantics, in-kernel row mask).
    N3, C3 = 100, 32
    x3 = jax.random.normal(k_x3, (N3, C3), dtype=jnp.float32)
    loss3 = jax.block_until_ready(
        focal_loss(x3, None, alpha=None, gamma=2.0, size_average=True,
                   _tile_rows=32))
    ref3 = _focal_loss_ref(x3, alpha=None, gamma=2.0, size_average=True)
    assert jnp.allclose(loss3, ref3, rtol=2e-3, atol=1e-5), (loss3, ref3)

    print("KERNEL_OK")
</pallas_src>

<mosaic_0001>
module attributes {stable_mosaic.version = 11 : i64} {
  func.func @_focal_loss_kernel(%arg0: i32, %arg1: memref<8x32xf32, #tpu.memory_space<vmem>>, %arg2: memref<8x128xf32, #tpu.memory_space<vmem>>) attributes {dimension_semantics = [#tpu.dimension_semantics<parallel>], iteration_bounds = array<i64: 1>, scalar_prefetch = 0 : i64, scratch_operands = 0 : i64, tpu.core_type = #tpu.core_type<tc>, window_params = [{transform_indices = @transform_0, window_bounds = array<i64: 8, 32>}, {transform_indices = @transform_1, window_bounds = array<i64: 8, 128>}]} {
    %c0 = arith.constant 0 : index
    %c0_0 = arith.constant 0 : index
    %0 = vector.load %arg1[%c0, %c0_0] : memref<8x32xf32, #tpu.memory_space<vmem>>, vector<8x32xf32>
    %cst = arith.constant dense<0xFF800000> : vector<8xf32>
    %1 = vector.multi_reduction <maximumf>, %0, %cst [1] : vector<8x32xf32> to vector<8xf32>
    %2 = vector.shape_cast %1 : vector<8xf32> to vector<8x1xf32>
    %3 = vector.broadcast %2 : vector<8x1xf32> to vector<8x32xf32>
    %4 = arith.subf %0, %3 : vector<8x32xf32>
    %5 = math.exp %4 : vector<8x32xf32>
    %cst_1 = arith.constant dense<0.000000e+00> : vector<8xf32>
    %6 = vector.multi_reduction <add>, %5, %cst_1 [1] : vector<8x32xf32> to vector<8xf32>
    %7 = vector.shape_cast %6 : vector<8xf32> to vector<8x1xf32>
    %8 = tpu.reciprocal %7 {approx = true} : vector<8x1xf32> -> vector<8x1xf32>
    %9 = vector.broadcast %8 : vector<8x1xf32> to vector<8x32xf32>
    %10 = arith.mulf %5, %9 : vector<8x32xf32>
    %11 = math.log %7 : vector<8x1xf32>
    %12 = vector.broadcast %11 : vector<8x1xf32> to vector<8x32xf32>
    %13 = arith.subf %4, %12 : vector<8x32xf32>
    %cst_2 = arith.constant 1.000000e+00 : f32
    %14 = vector.broadcast %cst_2 : f32 to vector<8x32xf32>
    %15 = arith.subf %14, %10 : vector<8x32xf32>
    %16 = arith.mulf %15, %15 : vector<8x32xf32>
    %17 = arith.mulf %16, %13 : vector<8x32xf32>
    %cst_3 = arith.constant dense<0.000000e+00> : vector<8xf32>
    %18 = vector.multi_reduction <add>, %17, %cst_3 [1] : vector<8x32xf32> to vector<8xf32>
    %19 = vector.shape_cast %18 : vector<8xf32> to vector<8x1xf32>
    %20 = vector.shape_cast %19 : vector<8x1xf32> to vector<1x8x1xf32>
    %cst_4 = arith.constant dense<0.000000e+00> : vector<1xf32>
    %21 = vector.multi_reduction <add>, %20, %cst_4 [1, 2] : vector<1x8x1xf32> to vector<1xf32>
    %22 = vector.shape_cast %21 : vector<1xf32> to vector<1x1x1xf32>
    %23 = vector.extract %22[0, 0, 0] : f32 from vector<1x1x1xf32>
    %24 = tpu.iota {dimensions = array<i32: 0>} : vector<8x128xi32>
    %25 = tpu.iota {dimensions = array<i32: 1>} : vector<8x128xi32>
    %c0_i32 = arith.constant 0 : i32
    %26 = vector.broadcast %c0_i32 : i32 to vector<8x128xi32>
    %27 = arith.cmpi eq, %24, %26 : vector<8x128xi32>
    %c0_i32_5 = arith.constant 0 : i32
    %28 = vector.broadcast %c0_i32_5 : i32 to vector<8x128xi32>
    %29 = arith.cmpi eq, %25, %28 : vector<8x128xi32>
    %30 = arith.andi %27, %29 : vector<8x128xi1>
    %cst_6 = arith.constant 0.000000e+00 : f32
    %31 = vector.broadcast %23 : f32 to vector<8x128xf32>
    %32 = vector.broadcast %cst_6 : f32 to vector<8x128xf32>
    %33 = arith.select %30, %31, %32 : vector<8x128xi1>, vector<8x128xf32>
    %c0_7 = arith.constant 0 : index
    %c0_8 = arith.constant 0 : index
    %34 = vector.load %arg2[%c0_7, %c0_8] : memref<8x128xf32, #tpu.memory_space<vmem>>, vector<8x128xf32>
    tpu.vector_store %arg2[%c0_7, %c0_8], %33 {strides = array<i32>} : memref<8x128xf32, #tpu.memory_space<vmem>>, vector<8x128xf32>,
    return
  }
  func.func @transform_0(%arg0: i32) -> (i32, i32) {
    %c0_i32 = arith.constant 0 : i32
    %c0_i32_0 = arith.constant 0 : i32
    return %arg0, %c0_i32 : i32, i32
  }
  func.func @transform_1(%arg0: i32) -> (i32, i32) {
    %c0_i32 = arith.constant 0 : i32
    %c0_i32_0 = arith.constant 0 : i32
    return %arg0, %c0_i32 : i32, i32
  }
}

</mosaic_0001>

<bundles_post_ra>
// kernel: tpu_custom_call.1
= control target key start
LH: loop header
LB: loop body
LE: loop exit
PB: predicated region body
PF: predicated region fallthrough
CT: control target
= control target key end

     0   :  { %6 = vsyncpa [#allocation3], 0  ;;  %s176_s0 = inlined_call_operand.hbm [shape: f32[8,32], index: 0, kind: input, shape index: {}]   ;;  %s177_s1 = inlined_call_operand.hbm [shape: f32[8,128], index: 1, kind: output, shape index: {}]  }
   0x1   :  { %7 = vsyncpa [#allocation4], 0  ;;  %s137_s6 = smov [#allocation2]   ;;  %s89_s10 = scalar_lea.hbm %s176_s0, 128 }
   0x2   :  { %s14_s7 = sshll.u32 %s137_s6, 4  ;;  %p90_p0 = scmp.ne.s32.totalorder %s176_s0, %s89_s10  ;;  %s15_s7 = int_to_ptr.vmem [resolvable:$true] %s14_s7 }
   0x3   :  { %p93_p1 = scmp.lt.u32.totalorder %s89_s10, %s176_s0 }
   0x5   :  { %p95_p2 = pnand %p93_p1, %p90_p0 }
   0x7   :  { %98 = shalt.err (!%p95_p2)
}
   0x8   :  { %s99_s15 = scalar_lea.vmem %s15_s7, 128  ;;  %p104_p4 = scmp.lt.s32.totalorder %s15_s7, %s15_s7 }
   0x9   :  { %p100_p3 = scmp.ne.s32.totalorder %s15_s7, %s99_s15  ;;  %p105_p5 = scmp.lt.s32.totalorder %s99_s15, %s99_s15 }
   0xb   :  { %p106_p6 = por %p105_p5, %p104_p4 }
   0xd   :  { %p107_p7 = pnand %p106_p6, %p100_p3 }
   0xf   :  { %110 = shalt.err (!%p107_p7)
}
  0x10   :  { %17 = dma.hbm_to_vmem [thread:$0]  %s176_s0, 128, %s15_s7, [#allocation3]  }
  0x11   :  { %133 = dma.done.wait [#allocation3], 128  }
  0x12   :  { %134 = vsyncadd [#allocation3], 4294967168  ;;  %vm22_vm0 = vcmask 261120   ;;  %v21_v0 = vld [vmem:[#allocation2] sm:$0xff]  ;;  %vm43_vm1 = vcmask 7168   ;;  %v54_v26 = vlaneseq  ;;  %s138_s0 = smov [#allocation5]  }
  0x13   :  { %v23_v1 = vsel %vm22_vm0, %v21_v0, -inf  ;;  %s70_s18 = sshll.u32 %s138_s0, 4  ;;  %s71_s18 = int_to_ptr.vmem [resolvable:$true] %s70_s18 }
  0x14   :  { %24 = vmax.xlane.f32.xlu0 %v23_v1  ;;  %v55_v27 = vshrl.u32 %v54_v26, 7  ;;  %v57_v28 = vand.u32 127, %v54_v26  ;;  %s111_s20 = scalar_lea.vmem %s71_s18, 128  ;;  %p116_p9 = scmp.lt.s32.totalorder %s71_s18, %s71_s18 }
  0x15   :  { %p112_p8 = scmp.ne.s32.totalorder %s71_s18, %s111_s20  ;;  %p117_p10 = scmp.lt.s32.totalorder %s111_s20, %s111_s20 }
  0x16   :  { %vm58_vm2 = vcmp.eq.s32.totalorder %v55_v27, 0  ;;  %vm59_vm3 = vcmp.eq.s32.totalorder %v57_v28, 0 }
  0x17   :  { %vm60_vm4 = vmand %vm58_vm2, %vm59_vm3  ;;  %p118_p11 = por %p117_p10, %p116_p9 }
  0x19   :  { %p119_p12 = pnand %p118_p11, %p112_p8 }
  0xa1   :  { %v25_v2 = vpop.xlane.xlu0 %24 }
  0xa2   :  { %v26_v3 = vsub.f32 %v21_v0, %v25_v2 }
  0xa4   :  { %v27_v4 = vmul.f32 1.442695, %v26_v3 }
  0xa6   :  { %83 = vpow2.f32 %v27_v4 }
  0xb0   :  { %v84_v5 = vpop.eup %83 }
  0xb1   :  { %v29_v6 = vsel %vm22_vm0, %v84_v5, 0.0 }
  0xb2   :  { %30 = vadd.xlane.f32.xlu0 %v29_v6 }
 0x13f   :  { %v31_v7 = vpop.xlane.xlu0 %30 }
 0x140   :  { %85 = vrcp.f32 %v31_v7 }
 0x141   :  { %87 = vlog2.f32 %v31_v7 }
 0x14a   :  { %v86_v8 = vpop.eup %85 }
 0x14b   :  { %v88_v9 = vpop.eup %87  ;;  %v33_v10 = vmul.f32 %v86_v8, %v84_v5 }
 0x14c   :  { %v35_v11 = vmul.f32 0.6931472, %v88_v9 }
 0x14d   :  { %v37_v12 = vsub.f32 1.0, %v33_v10 }
 0x14e   :  { %v36_v13 = vsub.f32 %v26_v3, %v35_v11 }
 0x14f   :  { %v38_v14 = vmul.f32 %v37_v12, %v37_v12 }
 0x151   :  { %v39_v15 = vmul.f32 %v38_v14, %v36_v13 }
 0x153   :  { %v40_v16 = vsel %vm22_vm0, %v39_v15, 0.0 }
 0x154   :  { %41 = vadd.xlane.f32.xlu1 %v40_v16 }
 0x1e1   :  { %v42_v17 = vpop.xlane.xlu1 %41 }
 0x1e2   :  { %v44_v18 = vsel %vm43_vm1, %v42_v17, 0.0 }
 0x1e3   :  { %45 = vadd.xlane.f32.xlu1 %v44_v18 }
 0x270   :  { %v46_v19 = vpop.xlane.xlu1 %45 }
 0x271   :  { %v47_v20 = vrot.slane %v46_v19, 4 }
 0x273   :  { %v48_v21 = vadd.f32 %v47_v20, %v46_v19 }
 0x275   :  { %v49_v22 = vrot.slane %v48_v21, 2 }
 0x277   :  { %v50_v23 = vadd.f32 %v49_v22, %v48_v21 }
 0x279   :  { %v51_v24 = vrot.slane %v50_v23, 1 }
 0x27b   :  { %v52_v25 = vadd.f32 %v51_v24, %v50_v23 }
 0x27d   :  { %79 = vpush %v52_v25 }
 0x2ae   :  { %s80_s19 = spop %79 }
 0x2af   :  { %v61_v29 = vstv %s80_s19 }
 0x2b0   :  { %v62_v30 = vsel %vm60_vm4, %v61_v29, 0.0 }
 0x2b1   :  { %63 = vst [vmem:[#allocation5] sm:$0xff] %v62_v30 }
 0x2b2   :  { %122 = shalt.err (!%p119_p12)
}
 0x2b3   :  { %s123_s23 = scalar_lea.hbm %s177_s1, 128 }
 0x2b4   :  { %p124_p13 = scmp.ne.s32.totalorder %s177_s1, %s123_s23  ;;  %p127_p0 = scmp.lt.u32.totalorder %s123_s23, %s177_s1 }
 0x2b6   :  { %p129_p1 = pnand %p127_p0, %p124_p13 }
 0x2b8   :  { %132 = shalt.err (!%p129_p1)
}
 0x2b9   :  { %73 = dma.vmem_to_hbm [thread:$0]  %s71_s18, 128, %s177_s1, [#allocation4]  }
 0x2ba   :  { %135 = dma.done.wait [#allocation4], 128  }
 0x2bb   :  { %136 = vsyncadd [#allocation4], 4294967168 }
 0x2bc   :  { %77 = vsyncpa [#allocation3], 1 }
 0x2bd   :  { %78 = vsyncpa [#allocation4], 1 }

</bundles_post_ra>
